<compile_context>
chip_gen: v6e
topology: v6e:2x2x1
jax: 0.10.0
libtpu: 0.0.40
codegen_flags: <defaults>
</compile_context>

<pallas_src>
import jax
import jax.numpy as jnp
from jax import lax
from jax.experimental import pallas as pl
from jax.experimental.pallas import tpu as pltpu


def _make_kernel(mxu_dtype):
    def _disc_kernel(x_ref, w1_ref, b1_ref, w2_ref, b2_ref, o_ref):
        # x_ref : [bm, in_dim] (stored dtype)   w1_ref: [H, in_dim]
        # b1_ref: [H, 1] f32   w2_ref: [H, 1] f32   b2_ref: [1, 1] f32 (SMEM)
        # o_ref : [1, bm] f32
        x = x_ref[...].astype(mxu_dtype)      # in-kernel cast (no-op if stored narrow)
        w1 = w1_ref[...].astype(mxu_dtype)
        # Contract on the last dim of both operands: [H, in_dim] x [bm, in_dim] -> [H, bm]
        h = lax.dot_general(w1, x, (((1,), (1,)), ((), ())),
                            preferred_element_type=jnp.float32)
        h = jax.nn.sigmoid(h + b1_ref[...])                   # bias bcast over lanes, f32
        # Second (H -> 1) layer: VPU multiply + XLU sublane reduce.
        y = jnp.sum(h * w2_ref[...], axis=0, keepdims=True)   # [1, bm]
        y = y + b2_ref[0, 0]
        o_ref[...] = jax.nn.sigmoid(y).astype(o_ref.dtype)
    return _disc_kernel


def _tpu_vmem_and_cores():
    """Generation-aware VMEM capacity and TensorCore count (robust fallbacks)."""
    vmem = 64 << 20   # conservative (v7x per-TC) default
    cores = 1
    try:
        info = pltpu.get_tpu_info()
        vmem = int(getattr(info, "vmem_capacity_bytes", vmem) or vmem)
        for name in ("num_cores", "core_count", "tensorcore_count"):
            val = getattr(info, name, None)
            if val:
                cores = int(val)
                break
    except Exception:
        pass
    return vmem, max(1, cores)


def _pick_block_batch(B, in_dim, x_itemsize, H, *, vmem_budget_bytes, num_cores=1):
    """Bytes-per-tile / VMEM-aware batch tile.

    - Ragged or tiny batches: single full-array tile (zero extra grid steps).
    - Otherwise the largest lane-aligned divisor of B whose double-buffered x
      tile + f32 hidden fits the VMEM budget (fewest grid steps; ~0.35us/step
      overhead dominates small tiles).
    - On multi-TensorCore parts prefer a step count that is a multiple of the
      core count with >= 2 steps per core so no core idles and per-core
      double-buffering can overlap DMA with compute.
    """
    per_row = 2 * in_dim * x_itemsize + H * 4 + 2 * 4        # x dbuf + hidden + out dbuf
    fixed = H * in_dim * 4 + 2 * H * 4 + (256 << 10)         # resident weights + slack
    cap = max(128, int((vmem_budget_bytes - fixed) // per_row))

    if B % 128 != 0 or B <= 128:
        return B                                             # single (possibly ragged) tile
    if B <= cap and num_cores <= 1:
        return B                                             # one big tile on single-TC parts

    cands = [bm for bm in range(128, min(B, cap) + 1, 128) if B % bm == 0]
    if not cands:
        return B if B <= cap else 128
    cands.sort(reverse=True)
    if num_cores > 1:
        even = [bm for bm in cands
                if (B // bm) % num_cores == 0 and (B // bm) >= 2 * num_cores]
        if even:
            cands = even
    return cands[0]


def discriminator_t_forward(data_t, w1, b1, w2, b2, *, block_batch=None,
                            compute_dtype=None):
    """Forward pass of Discriminator_t.

    data_t: [B, 2*num_items_t] (f32 or bf16; bf16 storage halves x HBM traffic)
    w1: [H, 2*num_items_t] (torch nn.Linear layout)   b1: [H]
    w2: [1, H]                                        b2: [1]
    compute_dtype: MXU input dtype (default: data_t.dtype). Narrowing happens
                   in-kernel; accumulation / bias / sigmoid stay f32.
    Returns [B, 1] f32.
    """
    B, in_dim = data_t.shape
    H = w1.shape[0]
    mxu_dtype = jnp.dtype(compute_dtype) if compute_dtype is not None else jnp.dtype(data_t.dtype)
    x_itemsize = jnp.dtype(data_t.dtype).itemsize

    vmem_cap, num_cores = _tpu_vmem_and_cores()
    # ~40 MiB budget on v7x (64 MiB physical per TC), ~80 MiB on v5e/v6e (128 MiB).
    vmem_budget = max(16 << 20, (vmem_cap * 5) // 8)

    bm = block_batch if block_batch is not None else _pick_block_batch(
        B, in_dim, x_itemsize, H, vmem_budget_bytes=vmem_budget, num_cores=num_cores)
    assert B % bm == 0, "batch must be divisible by the batch tile"
    assert bm == B or bm % 128 == 0, "partial batch tiles must be lane-aligned (128)"
    n_steps = B // bm

    # Small constant parameters (weights/biases) laid out wrapper-side.
    w1c = jnp.asarray(w1)                               # kept in stored dtype; cast in-kernel
    b1c = jnp.asarray(b1).reshape(H, 1).astype(jnp.float32)
    w2c = jnp.asarray(w2).reshape(H, 1).astype(jnp.float32)
    b2c = jnp.asarray(b2).reshape(1, 1).astype(jnp.float32)   # SMEM scalar
    w1_itemsize = jnp.dtype(w1c.dtype).itemsize

    est_vmem = (2 * bm * in_dim * x_itemsize            # x tiles (double-buffered)
                + H * in_dim * w1_itemsize              # W1 (resident, single-buffered)
                + 2 * H * 4                             # b1, w2 columns
                + H * bm * 4                            # hidden activation
                + 2 * bm * 4)                           # out tiles (double-buffered)
    vmem_limit = int(min(vmem_budget, max(2 * est_vmem, 24 << 20)))

    cost = pl.CostEstimate(
        flops=2 * B * in_dim * H + 2 * B * H,
        transcendentals=2 * B * (H + 1),                # sigmoid ~ exp + reciprocal
        bytes_accessed=(B * in_dim * x_itemsize + H * in_dim * w1_itemsize
                        + (2 * H + 1) * 4 + B * 4),
    )

    def run(single_buffer_weights):
        def weight_spec(shape):
            index_map = lambda i: (0,) * len(shape)     # constant index -> stays resident
            if single_buffer_weights:
                return pl.BlockSpec(shape, index_map, pipeline_mode=pl.Buffered(1))
            return pl.BlockSpec(shape, index_map)

        grid_spec = pltpu.PrefetchScalarGridSpec(
            num_scalar_prefetch=0,
            grid=(n_steps,),
            in_specs=[
                pl.BlockSpec((bm, in_dim), lambda i: (i, 0)),        # x, natural layout
                weight_spec((H, in_dim)),                            # W1
                weight_spec((H, 1)),                                 # b1 column
                weight_spec((H, 1)),                                 # w2 column
                pl.BlockSpec(memory_space=pltpu.MemorySpace.SMEM),   # b2 scalar
            ],
            out_specs=pl.BlockSpec((1, bm), lambda i: (0, i)),       # lane-dense out
        )
        return pl.pallas_call(
            _make_kernel(mxu_dtype),
            out_shape=jax.ShapeDtypeStruct((1, B), jnp.float32),
            grid_spec=grid_spec,
            compiler_params=pltpu.CompilerParams(
                dimension_semantics=("parallel",),
                vmem_limit_bytes=vmem_limit,
            ),
            cost_estimate=cost,
        )(data_t, w1c, b1c, w2c, b2c)

    try:
        out = run(True)
    except Exception:
        # Fallback if single-buffered (pl.Buffered(1)) weight specs are rejected.
        out = run(False)
    return out.reshape(B, 1)
    # TODO(synk): optional fp8 x/W1 path on v7x (per-tensor scale folded into b1)
    # and fusing this 2-layer MLP into the surrounding training step for tiny B.


def init_params(key, num_items_t, hidden_size_dis_t):
    """Deterministic init matching nn.Linear U(-1/sqrt(fan_in), 1/sqrt(fan_in)),
    stored in torch layout: w [out, in], b [out]."""
    in_dim = num_items_t * 2
    k1, k2, k3, k4 = jax.random.split(key, 4)
    bound1 = 1.0 / jnp.sqrt(in_dim)
    bound2 = 1.0 / jnp.sqrt(hidden_size_dis_t)
    w1 = jax.random.uniform(k1, (hidden_size_dis_t, in_dim), jnp.float32, -bound1, bound1)
    b1 = jax.random.uniform(k2, (hidden_size_dis_t,), jnp.float32, -bound1, bound1)
    w2 = jax.random.uniform(k3, (1, hidden_size_dis_t), jnp.float32, -bound2, bound2)
    b2 = jax.random.uniform(k4, (1,), jnp.float32, -bound2, bound2)
    return w1, b1, w2, b2


def _reference(data_t, w1, b1, w2, b2):
    h = jax.nn.sigmoid(data_t.astype(jnp.float32) @ w1.T + b1)
    return jax.nn.sigmoid(h @ w2.T + b2)


if __name__ == "__main__":
    # Small config consistent with the module:
    #   num_items_t = 16 -> input dim 32, hidden_size_dis_t = 32, batch = 8
    num_items_t = 16
    hidden_size_dis_t = 32
    batch = 8

    key = jax.random.PRNGKey(0)
    k_data, k_params, k_big = jax.random.split(key, 3)

    data_t = jax.random.normal(k_data, (batch, num_items_t * 2), jnp.float32)
    w1, b1, w2, b2 = init_params(k_params, num_items_t, hidden_size_dis_t)
    ref = _reference(data_t, w1, b1, w2, b2)

    # f32 path (single full-array tile for the tiny batch).
    out = jax.block_until_ready(discriminator_t_forward(data_t, w1, b1, w2, b2))
    assert out.shape == (batch, 1)
    assert jnp.allclose(out, ref, atol=1e-5), "f32 mismatch vs reference"

    # bf16-storage path: producer stores x narrow; kernel reads bf16 directly,
    # casts W1 in-kernel, keeps f32 accumulation and f32 sigmoids.
    data_bf16 = data_t.astype(jnp.bfloat16)
    out_bf16 = jax.block_until_ready(
        discriminator_t_forward(data_bf16, w1, b1, w2, b2, compute_dtype=jnp.bfloat16))
    assert jnp.allclose(out_bf16, ref, atol=2e-2), "bf16 mismatch vs reference"

    # Lane-aligned larger batch: auto-picked tile plus an explicit 2-step grid.
    big_batch = 512
    data_big = jax.random.normal(k_big, (big_batch, num_items_t * 2), jnp.float32)
    ref_big = _reference(data_big, w1, b1, w2, b2)
    out_auto = jax.block_until_ready(discriminator_t_forward(data_big, w1, b1, w2, b2))
    assert out_auto.shape == (big_batch, 1)
    assert jnp.allclose(out_auto, ref_big, atol=1e-5), "auto-tiled mismatch vs reference"
    out_tiled = jax.block_until_ready(
        discriminator_t_forward(data_big, w1, b1, w2, b2, block_batch=256))
    assert jnp.allclose(out_tiled, ref_big, atol=1e-5), "multi-step mismatch vs reference"

    print("KERNEL_OK")
</pallas_src>

<mosaic_0001>
module attributes {stable_mosaic.version = 11 : i64} {
  func.func @_disc_kernel(%arg0: i32, %arg1: memref<8x32xf32, #tpu.memory_space<vmem>>, %arg2: memref<32x32xf32, #tpu.memory_space<vmem>>, %arg3: memref<32x1xf32, #tpu.memory_space<vmem>>, %arg4: memref<32x1xf32, #tpu.memory_space<vmem>>, %arg5: memref<1x1xf32, #tpu.memory_space<smem>>, %arg6: memref<1x8xf32, #tpu.memory_space<vmem>>) attributes {dimension_semantics = [#tpu.dimension_semantics<parallel>], iteration_bounds = array<i64: 1>, scalar_prefetch = 0 : i64, scratch_operands = 0 : i64, tpu.core_type = #tpu.core_type<tc>, window_params = [{transform_indices = @transform_0, window_bounds = array<i64: 8, 32>}, {pipeline_mode = #tpu.pipeline_mode<synchronous>, transform_indices = @transform_1, window_bounds = array<i64: 32, 32>}, {pipeline_mode = #tpu.pipeline_mode<synchronous>, transform_indices = @transform_2, window_bounds = array<i64: 32, 1>}, {pipeline_mode = #tpu.pipeline_mode<synchronous>, transform_indices = @transform_3, window_bounds = array<i64: 32, 1>}, {transform_indices = @transform_4, window_bounds = array<i64: 1, 1>}, {transform_indices = @transform_5, window_bounds = array<i64: 1, 8>}]} {
    %c0 = arith.constant 0 : index
    %c0_0 = arith.constant 0 : index
    %0 = vector.load %arg1[%c0, %c0_0] : memref<8x32xf32, #tpu.memory_space<vmem>>, vector<8x32xf32>
    %c0_1 = arith.constant 0 : index
    %c0_2 = arith.constant 0 : index
    %1 = vector.load %arg2[%c0_1, %c0_2] : memref<32x32xf32, #tpu.memory_space<vmem>>, vector<32x32xf32>
    %cst = arith.constant dense<0.000000e+00> : vector<32x8xf32>
    %2 = tpu.matmul %1, %0, %cst {dimension_numbers = #tpu.dot_dimension_numbers<[1], [1], [0], [0], [0, 0, 1, 0], [], []>} : vector<32x32xf32>, vector<8x32xf32>, vector<32x8xf32> -> vector<32x8xf32>
    %c0_3 = arith.constant 0 : index
    %c0_4 = arith.constant 0 : index
    %3 = vector.load %arg3[%c0_3, %c0_4] : memref<32x1xf32, #tpu.memory_space<vmem>>, vector<32x1xf32>
    %4 = vector.broadcast %3 : vector<32x1xf32> to vector<32x8xf32>
    %5 = arith.addf %2, %4 : vector<32x8xf32>
    %6 = arith.negf %5 : vector<32x8xf32>
    %7 = math.exp %6 : vector<32x8xf32>
    %cst_5 = arith.constant 1.000000e+00 : f32
    %8 = vector.broadcast %cst_5 : f32 to vector<32x8xf32>
    %9 = arith.addf %8, %7 : vector<32x8xf32>
    %10 = arith.divf %8, %9 : vector<32x8xf32>
    %c0_6 = arith.constant 0 : index
    %c0_7 = arith.constant 0 : index
    %11 = vector.load %arg4[%c0_6, %c0_7] : memref<32x1xf32, #tpu.memory_space<vmem>>, vector<32x1xf32>
    %12 = vector.broadcast %11 : vector<32x1xf32> to vector<32x8xf32>
    %13 = arith.mulf %10, %12 : vector<32x8xf32>
    %cst_8 = arith.constant dense<0.000000e+00> : vector<8xf32>
    %14 = vector.multi_reduction <add>, %13, %cst_8 [0] : vector<32x8xf32> to vector<8xf32>
    %15 = vector.shape_cast %14 : vector<8xf32> to vector<1x8xf32>
    %c0_9 = arith.constant 0 : index
    %c0_10 = arith.constant 0 : index
    %16 = memref.load %arg5[%c0_9, %c0_10] : memref<1x1xf32, #tpu.memory_space<smem>>
    %17 = vector.broadcast %16 : f32 to vector<1x8xf32>
    %18 = arith.addf %15, %17 : vector<1x8xf32>
    %19 = arith.negf %18 : vector<1x8xf32>
    %20 = math.exp %19 : vector<1x8xf32>
    %cst_11 = arith.constant 1.000000e+00 : f32
    %21 = vector.broadcast %cst_11 : f32 to vector<1x8xf32>
    %22 = arith.addf %21, %20 : vector<1x8xf32>
    %23 = arith.divf %21, %22 : vector<1x8xf32>
    %c0_12 = arith.constant 0 : index
    %c0_13 = arith.constant 0 : index
    %24 = vector.load %arg6[%c0_12, %c0_13] : memref<1x8xf32, #tpu.memory_space<vmem>>, vector<1x8xf32>
    tpu.vector_store %arg6[%c0_12, %c0_13], %23 {strides = array<i32>} : memref<1x8xf32, #tpu.memory_space<vmem>>, vector<1x8xf32>,
    return
  }
  func.func @transform_0(%arg0: i32) -> (i32, i32) {
    %c0_i32 = arith.constant 0 : i32
    %c0_i32_0 = arith.constant 0 : i32
    return %arg0, %c0_i32 : i32, i32
  }
  func.func @transform_1(%arg0: i32) -> (i32, i32) {
    %c0_i32 = arith.constant 0 : i32
    %c0_i32_0 = arith.constant 0 : i32
    %c0_i32_1 = arith.constant 0 : i32
    return %c0_i32, %c0_i32_0 : i32, i32
  }
  func.func @transform_2(%arg0: i32) -> (i32, i32) {
    %c0_i32 = arith.constant 0 : i32
    %c0_i32_0 = arith.constant 0 : i32
    %c0_i32_1 = arith.constant 0 : i32
    return %c0_i32, %c0_i32_0 : i32, i32
  }
  func.func @transform_3(%arg0: i32) -> (i32, i32) {
    %c0_i32 = arith.constant 0 : i32
    %c0_i32_0 = arith.constant 0 : i32
    %c0_i32_1 = arith.constant 0 : i32
    return %c0_i32, %c0_i32_0 : i32, i32
  }
  func.func @transform_4(%arg0: i32) -> (i32, i32) {
    %c0_i32 = arith.constant 0 : i32
    %c0_i32_0 = arith.constant 0 : i32
    %c0_i32_1 = arith.constant 0 : i32
    return %c0_i32, %c0_i32_0 : i32, i32
  }
  func.func @transform_5(%arg0: i32) -> (i32, i32) {
    %c0_i32 = arith.constant 0 : i32
    %c0_i32_0 = arith.constant 0 : i32
    return %c0_i32, %arg0 : i32, i32
  }
}

module attributes {stable_mosaic.version = 11 : i64} {
  func.func @_disc_kernel(%arg0: i32, %arg1: memref<8x32xf32, #tpu.memory_space<vmem>>, %arg2: memref<32x32xf32, #tpu.memory_space<vmem>>, %arg3: memref<32x1xf32, #tpu.memory_space<vmem>>, %arg4: memref<32x1xf32, #tpu.memory_space<vmem>>, %arg5: memref<1x1xf32, #tpu.memory_space<smem>>, %arg6: memref<1x8xf32, #tpu.memory_space<vmem>>) attributes {dimension_semantics = [#tpu.dimension_semantics<parallel>], iteration_bounds = array<i64: 1>, scalar_prefetch = 0 : i64, scratch_operands = 0 : i64, tpu.core_type = #tpu.core_type<tc>, window_params = [{transform_indices = @transform_0, window_bounds = array<i64: 8, 32>}, {pipeline_mode = #tpu.pipeline_mode<synchronous>, transform_indices = @transform_1, window_bounds = array<i64: 32, 32>}, {pipeline_mode = #tpu.pipeline_mode<synchronous>, transform_indices = @transform_2, window_bounds = array<i64: 32, 1>}, {pipeline_mode = #tpu.pipeline_mode<synchronous>, transform_indices = @transform_3, window_bounds = array<i64: 32, 1>}, {transform_indices = @transform_4, window_bounds = array<i64: 1, 1>}, {transform_indices = @transform_5, window_bounds = array<i64: 1, 8>}]} {
    %c0 = arith.constant 0 : index
    %c0_0 = arith.constant 0 : index
    %0 = vector.load %arg1[%c0, %c0_0] : memref<8x32xf32, #tpu.memory_space<vmem>>, vector<8x32xf32>
    %c0_1 = arith.constant 0 : index
    %c0_2 = arith.constant 0 : index
    %1 = vector.load %arg2[%c0_1, %c0_2] : memref<32x32xf32, #tpu.memory_space<vmem>>, vector<32x32xf32>
    %cst = arith.constant dense<0.000000e+00> : vector<32x8xf32>
    %2 = tpu.matmul %1, %0, %cst {dimension_numbers = #tpu.dot_dimension_numbers<[1], [1], [0], [0], [0, 0, 1, 0], [], []>} : vector<32x32xf32>, vector<8x32xf32>, vector<32x8xf32> -> vector<32x8xf32>
    %c0_3 = arith.constant 0 : index
    %c0_4 = arith.constant 0 : index
    %3 = vector.load %arg3[%c0_3, %c0_4] : memref<32x1xf32, #tpu.memory_space<vmem>>, vector<32x1xf32>
    %4 = vector.broadcast %3 : vector<32x1xf32> to vector<32x8xf32>
    %5 = arith.addf %2, %4 : vector<32x8xf32>
    %6 = arith.negf %5 : vector<32x8xf32>
    %7 = math.exp %6 : vector<32x8xf32>
    %cst_5 = arith.constant 1.000000e+00 : f32
    %8 = vector.broadcast %cst_5 : f32 to vector<32x8xf32>
    %9 = arith.addf %8, %7 : vector<32x8xf32>
    %10 = arith.divf %8, %9 : vector<32x8xf32>
    %c0_6 = arith.constant 0 : index
    %c0_7 = arith.constant 0 : index
    %11 = vector.load %arg4[%c0_6, %c0_7] : memref<32x1xf32, #tpu.memory_space<vmem>>, vector<32x1xf32>
    %12 = vector.broadcast %11 : vector<32x1xf32> to vector<32x8xf32>
    %13 = arith.mulf %10, %12 : vector<32x8xf32>
    %cst_8 = arith.constant dense<0.000000e+00> : vector<8xf32>
    %14 = vector.multi_reduction <add>, %13, %cst_8 [0] : vector<32x8xf32> to vector<8xf32>
    %15 = vector.shape_cast %14 : vector<8xf32> to vector<1x8xf32>
    %c0_9 = arith.constant 0 : index
    %c0_10 = arith.constant 0 : index
    %16 = memref.load %arg5[%c0_9, %c0_10] : memref<1x1xf32, #tpu.memory_space<smem>>
    %17 = vector.broadcast %16 : f32 to vector<1x8xf32>
    %18 = arith.addf %15, %17 : vector<1x8xf32>
    %19 = arith.negf %18 : vector<1x8xf32>
    %20 = math.exp %19 : vector<1x8xf32>
    %cst_11 = arith.constant 1.000000e+00 : f32
    %21 = vector.broadcast %cst_11 : f32 to vector<1x8xf32>
    %22 = arith.addf %21, %20 : vector<1x8xf32>
    %23 = arith.divf %21, %22 : vector<1x8xf32>
    %c0_12 = arith.constant 0 : index
    %c0_13 = arith.constant 0 : index
    %24 = vector.load %arg6[%c0_12, %c0_13] : memref<1x8xf32, #tpu.memory_space<vmem>>, vector<1x8xf32>
    tpu.vector_store %arg6[%c0_12, %c0_13], %23 {strides = array<i32>} : memref<1x8xf32, #tpu.memory_space<vmem>>, vector<1x8xf32>,
    return
  }
  func.func @transform_0(%arg0: i32) -> (i32, i32) {
    %c0_i32 = arith.constant 0 : i32
    %c0_i32_0 = arith.constant 0 : i32
    return %arg0, %c0_i32 : i32, i32
  }
  func.func @transform_1(%arg0: i32) -> (i32, i32) {
    %c0_i32 = arith.constant 0 : i32
    %c0_i32_0 = arith.constant 0 : i32
    %c0_i32_1 = arith.constant 0 : i32
    return %c0_i32, %c0_i32_0 : i32, i32
  }
  func.func @transform_2(%arg0: i32) -> (i32, i32) {
    %c0_i32 = arith.constant 0 : i32
    %c0_i32_0 = arith.constant 0 : i32
    %c0_i32_1 = arith.constant 0 : i32
    return %c0_i32, %c0_i32_0 : i32, i32
  }
  func.func @transform_3(%arg0: i32) -> (i32, i32) {
    %c0_i32 = arith.constant 0 : i32
    %c0_i32_0 = arith.constant 0 : i32
    %c0_i32_1 = arith.constant 0 : i32
    return %c0_i32, %c0_i32_0 : i32, i32
  }
  func.func @transform_4(%arg0: i32) -> (i32, i32) {
    %c0_i32 = arith.constant 0 : i32
    %c0_i32_0 = arith.constant 0 : i32
    %c0_i32_1 = arith.constant 0 : i32
    return %c0_i32, %c0_i32_0 : i32, i32
  }
  func.func @transform_5(%arg0: i32) -> (i32, i32) {
    %c0_i32 = arith.constant 0 : i32
    %c0_i32_0 = arith.constant 0 : i32
    return %c0_i32, %arg0 : i32, i32
  }
}

</mosaic_0001>

<bundles_post_ra>
// kernel: tpu_custom_call.1
= control target key start
LH: loop header
LB: loop body
LE: loop exit
PB: predicated region body
PF: predicated region fallthrough
CT: control target
= control target key end

     0   :  { %vm51_vm0 = vcmask 261120   ;;  %v314_v7 = vmov 0   ;;  %s399_s0 = inlined_call_operand.vmem [shape: f32[8,32], index: 0, kind: input, shape index: {}]   ;;  %s400_s1 = inlined_call_operand.vmem [shape: f32[32,32], index: 1, kind: input, shape index: {}]   ;;  %s401_s2 = inlined_call_operand.vmem [shape: f32[32,1], index: 2, kind: input, shape index: {}]   ;;  %s402_s3 = inlined_call_operand.vmem [shape: f32[32,1], index: 3, kind: input, shape index: {}]   ;;  %s403_s4 = inlined_call_operand.<no memory space> [shape: f32[1,1], index: 4, kind: input, shape index: {}]   ;;  %s404_s5 = inlined_call_operand.hbm [shape: f32[1,8], index: 5, kind: output, shape index: {}]  }
   0x1   :  { %v22_v0 = vld [vmem:[%s399_s0] sm:$0xff]  ;;  %v25_v2 = vld [vmem:[%s400_s1 + $0x10] sm:$0xff]  ;;  %v24_v3 = vld [vmem:[%s400_s1 + $0x8] sm:$0xff]  ;;  %270 = vset.pattern.permute.xlu0 %v314_v7  ;;  %271 = vset.pattern.permute.xlu1 %v314_v7 }
   0x2   :  { %v23_v1 = vld [vmem:[%s400_s1] sm:$0xff]  ;;  %258 = vmatprep.subr.msk.mxu0 %vm51_vm0, %v22_v0  ;;  %266 = vmatprep.subr.msk.mxu1 %vm51_vm0, %v22_v0  ;;  %v26_v4 = vld [vmem:[%s400_s1 + $0x18] sm:$0xff]  ;;  %v29_v6 = vld [vmem:[%s401_s2 + $0x10] sm:$0xff] }
   0x3   :  { %259 = vmatpush3.xpose.msk.msra.mxu0 %vm51_vm0, %v22_v0  ;;  %267 = vmatpush3.xpose.msk.msra.mxu1 %vm51_vm0, %v22_v0  ;;  %v27_v5 = vld [vmem:[%s401_s2] sm:$0xff] }
   0x4   :  { %260 = vmatprep.mubr.msk.f32.mxu0 %vm51_vm0, %v23_v1  ;;  %263 = vmatprep.mubr.msk.f32.mxu1 %vm51_vm0, %v25_v2 }
   0x5   :  { %11 = vsyncpa [#allocation4], 0  ;;  %33 = vperm.xlu0 %270, %v27_v5   ;;  %43 = vperm.xlu1 %271, %v29_v6   ;;  %v28_v8 = vld [vmem:[%s401_s2 + $0x8] sm:$0xff]  ;;  %v30_v9 = vld [vmem:[%s401_s2 + $0x18] sm:$0xff]  ;;  %vm204_vm1 = vcmask 64512   ;;  %v219_v62 = vstv %s403_s4  ;;  %s315_s17 = smov [#allocation3]  }
   0x6   :  { %261 = vmatmul.mubr.msk.f32.vlgmr.msra.gmra.mxu0 %vm51_vm0, %v24_v3  ;;  %264 = vmatmul.mubr.msk.f32.vlgmr.msra.gmra.mxu1 %vm51_vm0, %v26_v4  ;;  %v176_v10 = vld [vmem:[%s402_s3] sm:$0xff]  ;;  %v177_v11 = vld [vmem:[%s402_s3 + $0x8] sm:$0xff]  ;;  %v178_v12 = vld [vmem:[%s402_s3 + $0x10] sm:$0xff]  ;;  %s235_s18 = sshll.u32 %s315_s17, 4  ;;  %vm227_vm2 = vcmask 57344   ;;  %s236_s18 = int_to_ptr.vmem [resolvable:$true] %s235_s18 }
   0x7   :  { %v179_v13 = vld [vmem:[%s402_s3 + $0x18] sm:$0xff]  ;;  %s292_s19 = scalar_lea.vmem %s236_s18, 16  ;;  %s296_s20 = scalar_lea.vmem %s236_s18, 32 }
   0x8   :  { %p293_p0 = scmp.ne.s32.totalorder %s236_s18, %s292_s19  ;;  %p297_p1 = scmp.lt.s32.totalorder %s236_s18, %s236_s18 }
   0x9   :  { %38 = vperm.xlu0 %270, %v28_v8   ;;  %48 = vperm.xlu1 %271, %v30_v9   ;;  %p298_p2 = scmp.lt.s32.totalorder %s296_s20, %s292_s19 }
   0xb   :  { %p299_p3 = por %p298_p2, %p297_p1 }
   0xd   :  { %182 = vperm.xlu0 %270, %v176_v10   ;;  %187 = vperm.xlu1 %271, %v177_v11   ;;  %p300_p4 = pnand %p299_p3, %p293_p0 }
  0x11   :  { %192 = vperm.xlu0 %270, %v178_v12   ;;  %197 = vperm.xlu1 %271, %v179_v13  }
  0x80   :  { %v34_v14 = vpop.permute.xlu0 %33  ;;  %v44_v15 = vpop.permute.xlu1 %43 }
  0x84   :  { %v39_v16 = vpop.permute.xlu0 %38  ;;  %v49_v17 = vpop.permute.xlu1 %48 }
  0x88   :  { %v183_v38 = vpop.permute.xlu0 %182  ;;  %v188_v39 = vpop.permute.xlu1 %187 }
  0x8c   :  { %v193_v45 = vpop.permute.xlu0 %192  ;;  %v198_v47 = vpop.permute.xlu1 %197 }
  0xc6   :  { %v262_v18 = vpop.f32.mrf.mxu0  ;;  %v265_v19 = vpop.f32.mrf.mxu1 }
  0xc7   :  { %v139_v20 = vadd.f32 %v262_v18, %v39_v16  ;;  %v149_v21 = vadd.f32 %v265_v19, %v49_v17 }
  0xc8   :  { %v133_v22 = vpop.f32.mrf.mxu0  ;;  %v143_v23 = vpop.f32.mrf.mxu1 }
  0xc9   :  { %v249_v24 = vmul.f32 -1.442695, %v139_v20  ;;  %v251_v25 = vmul.f32 -1.442695, %v149_v21  ;;  %v134_v26 = vadd.f32 %v133_v22, %v34_v14  ;;  %v144_v27 = vadd.f32 %v143_v23, %v44_v15 }
  0xcb   :  { %272 = vpow2.f32 %v249_v24  ;;  %v248_v28 = vmul.f32 -1.442695, %v134_v26  ;;  %v250_v29 = vmul.f32 -1.442695, %v144_v27 }
  0xcc   :  { %274 = vpow2.f32 %v251_v25 }
  0xcd   :  { %276 = vpow2.f32 %v248_v28 }
  0xce   :  { %278 = vpow2.f32 %v250_v29 }
  0xd8   :  { %v273_v30 = vpop.eup %272 }
  0xd9   :  { %v275_v31 = vpop.eup %274  ;;  %v165_v32 = vadd.f32 1.0, %v273_v30 }
  0xda   :  { %v277_v33 = vpop.eup %276  ;;  %v167_v34 = vadd.f32 1.0, %v275_v31 }
  0xdb   :  { %v279_v35 = vpop.eup %278  ;;  %280 = vrcp.f32 %v165_v32  ;;  %v164_v36 = vadd.f32 1.0, %v277_v33 }
  0xdc   :  { %282 = vrcp.f32 %v167_v34  ;;  %v166_v37 = vadd.f32 1.0, %v279_v35 }
  0xdd   :  { %284 = vrcp.f32 %v164_v36 }
  0xde   :  { %286 = vrcp.f32 %v166_v37 }
  0xe8   :  { %v281_v40 = vpop.eup %280 }
  0xe9   :  { %v283_v41 = vpop.eup %282  ;;  %v201_v42 = vmul.f32 %v281_v40, %v188_v39 }
  0xea   :  { %v285_v43 = vpop.eup %284  ;;  %v203_v49 = vmul.f32 %v283_v41, %v198_v47 }
  0xeb   :  { %v287_v44 = vpop.eup %286  ;;  %v200_v46 = vmul.f32 %v285_v43, %v183_v38  ;;  %v206_v50 = vsel %vm204_vm1, %v201_v42, 0.0 }
  0xec   :  { %v202_v48 = vmul.f32 %v287_v44, %v193_v45  ;;  %v210_v55 = vsel %vm204_vm1, %v203_v49, 0.0 }
  0xed   :  { %v205_v51 = vsel %vm204_vm1, %v200_v46, 0.0 }
  0xee   :  { %v207_v52 = vadd.f32 %v206_v50, %v205_v51  ;;  %v208_v53 = vsel %vm204_vm1, %v202_v48, 0.0 }
  0xf0   :  { %v209_v54 = vadd.f32 %v208_v53, %v207_v52 }
  0xf2   :  { %v211_v56 = vadd.f32 %v210_v55, %v209_v54 }
  0xf4   :  { %v212_v57 = vrot.slane %v211_v56, 4 }
  0xf6   :  { %v213_v58 = vadd.f32 %v212_v57, %v211_v56 }
  0xf8   :  { %v214_v59 = vrot.slane %v213_v58, 2 }
  0xfa   :  { %v215_v60 = vadd.f32 %v214_v59, %v213_v58 }
  0xfc   :  { %v216_v61 = vrot.slane %v215_v60, 1 }
  0xfe   :  { %v217_v63 = vadd.f32 %v216_v61, %v215_v60 }
 0x100   :  { %v220_v0 = vadd.f32 %v219_v62, %v217_v63 }
 0x102   :  { %v252_v1 = vmul.f32 -1.442695, %v220_v0 }
 0x104   :  { %288 = vpow2.f32 %v252_v1 }
 0x111   :  { %v289_v2 = vpop.eup %288 }
 0x112   :  { %v224_v3 = vadd.f32 1.0, %v289_v2 }
 0x114   :  { %290 = vrcp.f32 %v224_v3 }
 0x121   :  { %v291_v4 = vpop.eup %290 }
 0x122   :  { %228 = vst.msk [vmem:[#allocation3] sm:$0x1] %vm227_vm2, %v291_v4 }
 0x123   :  { %303 = shalt.err (!%p300_p4)
}
 0x124   :  { %238 = dma.vmem_to_hbm [thread:$0]  %s236_s18, 16, %s404_s5, [#allocation4]  }
 0x125   :  { %312 = dma.done.wait [#allocation4], 16  }
 0x126   :  { %313 = vsyncadd [#allocation4], 4294967280 }
 0x127   :  { %242 = vsyncpa [#allocation4], 1 }

// kernel: tpu_custom_call.1
= control target key start
LH: loop header
LB: loop body
LE: loop exit
PB: predicated region body
PF: predicated region fallthrough
CT: control target
= control target key end

     0   :  { %vm51_vm0 = vcmask 261120   ;;  %v314_v7 = vmov 0   ;;  %s399_s0 = inlined_call_operand.vmem [shape: f32[8,32], index: 0, kind: input, shape index: {}]   ;;  %s400_s1 = inlined_call_operand.vmem [shape: f32[32,32], index: 1, kind: input, shape index: {}]   ;;  %s401_s2 = inlined_call_operand.vmem [shape: f32[32,1], index: 2, kind: input, shape index: {}]   ;;  %s402_s3 = inlined_call_operand.vmem [shape: f32[32,1], index: 3, kind: input, shape index: {}]   ;;  %s403_s4 = inlined_call_operand.<no memory space> [shape: f32[1,1], index: 4, kind: input, shape index: {}]   ;;  %s404_s5 = inlined_call_operand.hbm [shape: f32[1,8], index: 5, kind: output, shape index: {}]  }
   0x1   :  { %v22_v0 = vld [vmem:[%s399_s0] sm:$0xff]  ;;  %v25_v2 = vld [vmem:[%s400_s1 + $0x10] sm:$0xff]  ;;  %v24_v3 = vld [vmem:[%s400_s1 + $0x8] sm:$0xff]  ;;  %270 = vset.pattern.permute.xlu0 %v314_v7  ;;  %271 = vset.pattern.permute.xlu1 %v314_v7 }
   0x2   :  { %v23_v1 = vld [vmem:[%s400_s1] sm:$0xff]  ;;  %258 = vmatprep.subr.msk.mxu0 %vm51_vm0, %v22_v0  ;;  %266 = vmatprep.subr.msk.mxu1 %vm51_vm0, %v22_v0  ;;  %v26_v4 = vld [vmem:[%s400_s1 + $0x18] sm:$0xff]  ;;  %v29_v6 = vld [vmem:[%s401_s2 + $0x10] sm:$0xff] }
   0x3   :  { %259 = vmatpush3.xpose.msk.msra.mxu0 %vm51_vm0, %v22_v0  ;;  %267 = vmatpush3.xpose.msk.msra.mxu1 %vm51_vm0, %v22_v0  ;;  %v27_v5 = vld [vmem:[%s401_s2] sm:$0xff] }
   0x4   :  { %260 = vmatprep.mubr.msk.f32.mxu0 %vm51_vm0, %v23_v1  ;;  %263 = vmatprep.mubr.msk.f32.mxu1 %vm51_vm0, %v25_v2 }
   0x5   :  { %11 = vsyncpa [#allocation4], 0  ;;  %33 = vperm.xlu0 %270, %v27_v5   ;;  %43 = vperm.xlu1 %271, %v29_v6   ;;  %v28_v8 = vld [vmem:[%s401_s2 + $0x8] sm:$0xff]  ;;  %v30_v9 = vld [vmem:[%s401_s2 + $0x18] sm:$0xff]  ;;  %vm204_vm1 = vcmask 64512   ;;  %v219_v62 = vstv %s403_s4  ;;  %s315_s17 = smov [#allocation3]  }
   0x6   :  { %261 = vmatmul.mubr.msk.f32.vlgmr.msra.gmra.mxu0 %vm51_vm0, %v24_v3  ;;  %264 = vmatmul.mubr.msk.f32.vlgmr.msra.gmra.mxu1 %vm51_vm0, %v26_v4  ;;  %v176_v10 = vld [vmem:[%s402_s3] sm:$0xff]  ;;  %v177_v11 = vld [vmem:[%s402_s3 + $0x8] sm:$0xff]  ;;  %v178_v12 = vld [vmem:[%s402_s3 + $0x10] sm:$0xff]  ;;  %s235_s18 = sshll.u32 %s315_s17, 4  ;;  %vm227_vm2 = vcmask 57344   ;;  %s236_s18 = int_to_ptr.vmem [resolvable:$true] %s235_s18 }
   0x7   :  { %v179_v13 = vld [vmem:[%s402_s3 + $0x18] sm:$0xff]  ;;  %s292_s19 = scalar_lea.vmem %s236_s18, 16  ;;  %s296_s20 = scalar_lea.vmem %s236_s18, 32 }
   0x8   :  { %p293_p0 = scmp.ne.s32.totalorder %s236_s18, %s292_s19  ;;  %p297_p1 = scmp.lt.s32.totalorder %s236_s18, %s236_s18 }
   0x9   :  { %38 = vperm.xlu0 %270, %v28_v8   ;;  %48 = vperm.xlu1 %271, %v30_v9   ;;  %p298_p2 = scmp.lt.s32.totalorder %s296_s20, %s292_s19 }
   0xb   :  { %p299_p3 = por %p298_p2, %p297_p1 }
   0xd   :  { %182 = vperm.xlu0 %270, %v176_v10   ;;  %187 = vperm.xlu1 %271, %v177_v11   ;;  %p300_p4 = pnand %p299_p3, %p293_p0 }
  0x11   :  { %192 = vperm.xlu0 %270, %v178_v12   ;;  %197 = vperm.xlu1 %271, %v179_v13  }
  0x80   :  { %v34_v14 = vpop.permute.xlu0 %33  ;;  %v44_v15 = vpop.permute.xlu1 %43 }
  0x84   :  { %v39_v16 = vpop.permute.xlu0 %38  ;;  %v49_v17 = vpop.permute.xlu1 %48 }
  0x88   :  { %v183_v38 = vpop.permute.xlu0 %182  ;;  %v188_v39 = vpop.permute.xlu1 %187 }
  0x8c   :  { %v193_v45 = vpop.permute.xlu0 %192  ;;  %v198_v47 = vpop.permute.xlu1 %197 }
  0xc6   :  { %v262_v18 = vpop.f32.mrf.mxu0  ;;  %v265_v19 = vpop.f32.mrf.mxu1 }
  0xc7   :  { %v139_v20 = vadd.f32 %v262_v18, %v39_v16  ;;  %v149_v21 = vadd.f32 %v265_v19, %v49_v17 }
  0xc8   :  { %v133_v22 = vpop.f32.mrf.mxu0  ;;  %v143_v23 = vpop.f32.mrf.mxu1 }
  0xc9   :  { %v249_v24 = vmul.f32 -1.442695, %v139_v20  ;;  %v251_v25 = vmul.f32 -1.442695, %v149_v21  ;;  %v134_v26 = vadd.f32 %v133_v22, %v34_v14  ;;  %v144_v27 = vadd.f32 %v143_v23, %v44_v15 }
  0xcb   :  { %272 = vpow2.f32 %v249_v24  ;;  %v248_v28 = vmul.f32 -1.442695, %v134_v26  ;;  %v250_v29 = vmul.f32 -1.442695, %v144_v27 }
  0xcc   :  { %274 = vpow2.f32 %v251_v25 }
  0xcd   :  { %276 = vpow2.f32 %v248_v28 }
  0xce   :  { %278 = vpow2.f32 %v250_v29 }
  0xd8   :  { %v273_v30 = vpop.eup %272 }
  0xd9   :  { %v275_v31 = vpop.eup %274  ;;  %v165_v32 = vadd.f32 1.0, %v273_v30 }
  0xda   :  { %v277_v33 = vpop.eup %276  ;;  %v167_v34 = vadd.f32 1.0, %v275_v31 }
  0xdb   :  { %v279_v35 = vpop.eup %278  ;;  %280 = vrcp.f32 %v165_v32  ;;  %v164_v36 = vadd.f32 1.0, %v277_v33 }
  0xdc   :  { %282 = vrcp.f32 %v167_v34  ;;  %v166_v37 = vadd.f32 1.0, %v279_v35 }
  0xdd   :  { %284 = vrcp.f32 %v164_v36 }
  0xde   :  { %286 = vrcp.f32 %v166_v37 }
  0xe8   :  { %v281_v40 = vpop.eup %280 }
  0xe9   :  { %v283_v41 = vpop.eup %282  ;;  %v201_v42 = vmul.f32 %v281_v40, %v188_v39 }
  0xea   :  { %v285_v43 = vpop.eup %284  ;;  %v203_v49 = vmul.f32 %v283_v41, %v198_v47 }
  0xeb   :  { %v287_v44 = vpop.eup %286  ;;  %v200_v46 = vmul.f32 %v285_v43, %v183_v38  ;;  %v206_v50 = vsel %vm204_vm1, %v201_v42, 0.0 }
  0xec   :  { %v202_v48 = vmul.f32 %v287_v44, %v193_v45  ;;  %v210_v55 = vsel %vm204_vm1, %v203_v49, 0.0 }
  0xed   :  { %v205_v51 = vsel %vm204_vm1, %v200_v46, 0.0 }
  0xee   :  { %v207_v52 = vadd.f32 %v206_v50, %v205_v51  ;;  %v208_v53 = vsel %vm204_vm1, %v202_v48, 0.0 }
  0xf0   :  { %v209_v54 = vadd.f32 %v208_v53, %v207_v52 }
  0xf2   :  { %v211_v56 = vadd.f32 %v210_v55, %v209_v54 }
  0xf4   :  { %v212_v57 = vrot.slane %v211_v56, 4 }
  0xf6   :  { %v213_v58 = vadd.f32 %v212_v57, %v211_v56 }
  0xf8   :  { %v214_v59 = vrot.slane %v213_v58, 2 }
  0xfa   :  { %v215_v60 = vadd.f32 %v214_v59, %v213_v58 }
  0xfc   :  { %v216_v61 = vrot.slane %v215_v60, 1 }
  0xfe   :  { %v217_v63 = vadd.f32 %v216_v61, %v215_v60 }
 0x100   :  { %v220_v0 = vadd.f32 %v219_v62, %v217_v63 }
 0x102   :  { %v252_v1 = vmul.f32 -1.442695, %v220_v0 }
 0x104   :  { %288 = vpow2.f32 %v252_v1 }
 0x111   :  { %v289_v2 = vpop.eup %288 }
 0x112   :  { %v224_v3 = vadd.f32 1.0, %v289_v2 }
 0x114   :  { %290 = vrcp.f32 %v224_v3 }
 0x121   :  { %v291_v4 = vpop.eup %290 }
 0x122   :  { %228 = vst.msk [vmem:[#allocation3] sm:$0x1] %vm227_vm2, %v291_v4 }
 0x123   :  { %303 = shalt.err (!%p300_p4)
}
 0x124   :  { %238 = dma.vmem_to_hbm [thread:$0]  %s236_s18, 16, %s404_s5, [#allocation4]  }
 0x125   :  { %312 = dma.done.wait [#allocation4], 16  }
 0x126   :  { %313 = vsyncadd [#allocation4], 4294967280 }
 0x127   :  { %242 = vsyncpa [#allocation4], 1 }

</bundles_post_ra>
